<compile_context>
chip_gen: v6e
topology: v6e:2x2x1
jax: 0.10.0
libtpu: 0.0.40
codegen_flags: <defaults>
</compile_context>

<pallas_src>
import jax
import jax.numpy as jnp
from jax.experimental import pallas as pl
from jax.experimental.pallas import tpu as pltpu

EPS = 1e-5


def _bn_kernel(x_ref, g_ref, b_ref, o_ref):
    # x_ref: (bc, NT), g_ref/b_ref: (bc, 1), o_ref: (bc, NT)
    x = x_ref[...].astype(jnp.float32)
    n = x.shape[1]
    inv_n = 1.0 / n
    sum_x = jnp.sum(x, axis=-1, keepdims=True)           # (bc, 1) lane reduce
    sum_x2 = jnp.sum(x * x, axis=-1, keepdims=True)      # (bc, 1)
    mean = sum_x * inv_n
    var = jnp.maximum(sum_x2 * inv_n - mean * mean, 0.0)  # biased variance
    inv_std = jax.lax.rsqrt(var + EPS)
    gamma = g_ref[...].astype(jnp.float32)                # (bc, 1)
    beta = b_ref[...].astype(jnp.float32)                 # (bc, 1)
    scale = inv_std * gamma
    shift = beta - mean * scale
    o_ref[...] = (x * scale + shift).astype(o_ref.dtype)


def _vmem_budget_bytes():
    """Physical VMEM per core; conservative fallback (v7x = 64 MiB)."""
    try:
        cap = int(pltpu.get_tpu_info().vmem_capacity_bytes)
    except Exception:
        cap = 64 * 1024 * 1024
    return cap


def _pick_block_c(CV, NT, dtype_bytes, working_budget):
    """Largest channel block that (a) satisfies the sublane tiling rule
    (multiple of 8 or == CV), (b) divides CV, (c) fits the VMEM budget with
    double-buffered in/out plus f32 temporaries, preferring >= 2 grid steps."""
    cands = [d for d in range(8, CV + 1, 8) if CV % d == 0]
    cands.append(CV)
    cands = sorted(set(c for c in cands if c <= CV))

    def footprint(bc):
        io = 2 * 2 * bc * NT * dtype_bytes   # (in + out) x double buffer
        tmp = 2 * bc * NT * 4                # f32 x and output temporaries
        return io + tmp

    fitting = [bc for bc in cands if footprint(bc) <= working_budget]
    if not fitting:
        fitting = [cands[0]]
    multi_step = [bc for bc in fitting if CV // bc >= 2]
    pool = multi_step if multi_step else fitting
    return max(pool)


def norm_data_forward(x, gamma, beta, *, block_c=None):
    """x: (N, C, V, T); gamma, beta: (C*V,). Returns (N, C, V, T)."""
    N, C, V, T = x.shape
    CV = C * V
    NT = N * T
    dtype_bytes = jnp.dtype(x.dtype).itemsize

    vmem_cap = _vmem_budget_bytes()
    vmem_limit = int(vmem_cap * 0.75)               # explicit scoped limit
    working_budget = int(vmem_limit * 0.8)          # headroom for compiler

    if block_c is None:
        block_c = _pick_block_c(CV, NT, dtype_bytes, working_budget)
    assert CV % block_c == 0, "block_c must divide C*V"

    # Channel-major, lane-dense layout: (N, C, V, T) -> (C, V, N, T) -> (CV, N*T)
    x_cm = jnp.transpose(x, (1, 2, 0, 3)).reshape(CV, NT)
    g2 = gamma.reshape(CV, 1)
    b2 = beta.reshape(CV, 1)

    out_cm = pl.pallas_call(
        _bn_kernel,
        out_shape=jax.ShapeDtypeStruct((CV, NT), x.dtype),
        grid_spec=pltpu.PrefetchScalarGridSpec(
            num_scalar_prefetch=0,
            grid=(CV // block_c,),
            in_specs=[
                pl.BlockSpec((block_c, NT), lambda i: (i, 0)),
                pl.BlockSpec((block_c, 1), lambda i: (i, 0)),
                pl.BlockSpec((block_c, 1), lambda i: (i, 0)),
            ],
            out_specs=pl.BlockSpec((block_c, NT), lambda i: (i, 0)),
        ),
        compiler_params=pltpu.CompilerParams(
            dimension_semantics=("parallel",),
            vmem_limit_bytes=vmem_limit,
        ),
    )(x_cm, g2, b2)

    # Back to (N, C, V, T)
    return jnp.transpose(out_cm.reshape(C, V, N, T), (2, 0, 1, 3))


def _reference(x, gamma, beta):
    N, C, V, T = x.shape
    xf = x.reshape(N, C * V, T).astype(jnp.float32)
    mean = jnp.mean(xf, axis=(0, 2), keepdims=True)
    var = jnp.mean((xf - mean) ** 2, axis=(0, 2), keepdims=True)
    y = (xf - mean) / jnp.sqrt(var + EPS)
    y = y * gamma.reshape(1, -1, 1) + beta.reshape(1, -1, 1)
    return y.reshape(N, C, V, T).astype(x.dtype)


if __name__ == "__main__":
    # Small shapes consistent with the module: dim (=C) and num_joint (=V).
    N, C, V, T = 2, 4, 16, 16   # C*V = 64 channels for BatchNorm1d
    key = jax.random.PRNGKey(0)
    kx, kg, kb = jax.random.split(key, 3)

    x = jax.random.normal(kx, (N, C, V, T), dtype=jnp.float32)
    gamma = 1.0 + 0.1 * jax.random.normal(kg, (C * V,), dtype=jnp.float32)
    beta = 0.1 * jax.random.normal(kb, (C * V,), dtype=jnp.float32)

    out = norm_data_forward(x, gamma, beta)
    out = jax.block_until_ready(out)

    ref = _reference(x, gamma, beta)
    assert jnp.allclose(out, ref, atol=1e-4, rtol=1e-4), "mismatch vs reference"

    print("KERNEL_OK")
</pallas_src>

<mosaic_0001>
module attributes {stable_mosaic.version = 11 : i64} {
  func.func @_bn_kernel(%arg0: i32, %arg1: memref<32x32xf32, #tpu.memory_space<vmem>>, %arg2: memref<32x1xf32, #tpu.memory_space<vmem>>, %arg3: memref<32x1xf32, #tpu.memory_space<vmem>>, %arg4: memref<32x32xf32, #tpu.memory_space<vmem>>) attributes {dimension_semantics = [#tpu.dimension_semantics<parallel>], iteration_bounds = array<i64: 2>, scalar_prefetch = 0 : i64, scratch_operands = 0 : i64, tpu.core_type = #tpu.core_type<tc>, window_params = [{transform_indices = @transform_0, window_bounds = array<i64: 32, 32>}, {transform_indices = @transform_1, window_bounds = array<i64: 32, 1>}, {transform_indices = @transform_2, window_bounds = array<i64: 32, 1>}, {transform_indices = @transform_3, window_bounds = array<i64: 32, 32>}]} {
    %c0 = arith.constant 0 : index
    %c0_0 = arith.constant 0 : index
    %0 = vector.load %arg1[%c0, %c0_0] : memref<32x32xf32, #tpu.memory_space<vmem>>, vector<32x32xf32>
    %cst = arith.constant dense<0.000000e+00> : vector<32xf32>
    %1 = vector.multi_reduction <add>, %0, %cst [1] : vector<32x32xf32> to vector<32xf32>
    %2 = vector.shape_cast %1 : vector<32xf32> to vector<32x1xf32>
    %3 = arith.mulf %0, %0 : vector<32x32xf32>
    %cst_1 = arith.constant dense<0.000000e+00> : vector<32xf32>
    %4 = vector.multi_reduction <add>, %3, %cst_1 [1] : vector<32x32xf32> to vector<32xf32>
    %5 = vector.shape_cast %4 : vector<32xf32> to vector<32x1xf32>
    %cst_2 = arith.constant 3.125000e-02 : f32
    %6 = vector.broadcast %cst_2 : f32 to vector<32x1xf32>
    %7 = arith.mulf %2, %6 : vector<32x1xf32>
    %cst_3 = arith.constant 3.125000e-02 : f32
    %8 = vector.broadcast %cst_3 : f32 to vector<32x1xf32>
    %9 = arith.mulf %5, %8 : vector<32x1xf32>
    %10 = arith.mulf %7, %7 : vector<32x1xf32>
    %11 = arith.subf %9, %10 : vector<32x1xf32>
    %cst_4 = arith.constant 0.000000e+00 : f32
    %12 = vector.broadcast %cst_4 : f32 to vector<32x1xf32>
    %13 = arith.maximumf %11, %12 : vector<32x1xf32>
    %cst_5 = arith.constant 9.99999974E-6 : f32
    %14 = vector.broadcast %cst_5 : f32 to vector<32x1xf32>
    %15 = arith.addf %13, %14 : vector<32x1xf32>
    %16 = math.rsqrt %15 : vector<32x1xf32>
    %c0_6 = arith.constant 0 : index
    %c0_7 = arith.constant 0 : index
    %17 = vector.load %arg2[%c0_6, %c0_7] : memref<32x1xf32, #tpu.memory_space<vmem>>, vector<32x1xf32>
    %c0_8 = arith.constant 0 : index
    %c0_9 = arith.constant 0 : index
    %18 = vector.load %arg3[%c0_8, %c0_9] : memref<32x1xf32, #tpu.memory_space<vmem>>, vector<32x1xf32>
    %19 = arith.mulf %16, %17 : vector<32x1xf32>
    %20 = arith.mulf %7, %19 : vector<32x1xf32>
    %21 = arith.subf %18, %20 : vector<32x1xf32>
    %22 = vector.broadcast %19 : vector<32x1xf32> to vector<32x32xf32>
    %23 = arith.mulf %0, %22 : vector<32x32xf32>
    %24 = vector.broadcast %21 : vector<32x1xf32> to vector<32x32xf32>
    %25 = arith.addf %23, %24 : vector<32x32xf32>
    %c0_10 = arith.constant 0 : index
    %c0_11 = arith.constant 0 : index
    %26 = vector.load %arg4[%c0_10, %c0_11] : memref<32x32xf32, #tpu.memory_space<vmem>>, vector<32x32xf32>
    tpu.vector_store %arg4[%c0_10, %c0_11], %25 {strides = array<i32>} : memref<32x32xf32, #tpu.memory_space<vmem>>, vector<32x32xf32>,
    return
  }
  func.func @transform_0(%arg0: i32) -> (i32, i32) {
    %c0_i32 = arith.constant 0 : i32
    %c0_i32_0 = arith.constant 0 : i32
    return %arg0, %c0_i32 : i32, i32
  }
  func.func @transform_1(%arg0: i32) -> (i32, i32) {
    %c0_i32 = arith.constant 0 : i32
    %c0_i32_0 = arith.constant 0 : i32
    return %arg0, %c0_i32 : i32, i32
  }
  func.func @transform_2(%arg0: i32) -> (i32, i32) {
    %c0_i32 = arith.constant 0 : i32
    %c0_i32_0 = arith.constant 0 : i32
    return %arg0, %c0_i32 : i32, i32
  }
  func.func @transform_3(%arg0: i32) -> (i32, i32) {
    %c0_i32 = arith.constant 0 : i32
    %c0_i32_0 = arith.constant 0 : i32
    return %arg0, %c0_i32 : i32, i32
  }
}

</mosaic_0001>

<bundles_post_ra>
// kernel: tpu_custom_call.1
= control target key start
LH: loop header
LB: loop body
LE: loop exit
PB: predicated region body
PF: predicated region fallthrough
CT: control target
= control target key end

     0   :  { %s494_s12 = smov 0   ;;  %s559_s0 = inlined_call_operand.vmem [shape: f32[64,32], index: 0, kind: input, shape index: {}]   ;;  %s560_s1 = inlined_call_operand.vmem [shape: f32[64,1], index: 1, kind: input, shape index: {}]   ;;  %s561_s2 = inlined_call_operand.vmem [shape: f32[64,1], index: 2, kind: input, shape index: {}]   ;;  %s562_s3 = inlined_call_operand.vmem [shape: f32[64,32], index: 3, kind: output, shape index: {}]  }
   0x1 LB: > { %s431_s13 = sadd.s32 4294967295, %s471_s12   ;;  %p435_p0 = scmp.ge.s32.totalorder %s471_s12, 1  ;;  %s471_s12 = sphi %s494_s12, %s13_s12  }
   0x2   : > { %p160_p1 = scmp.lt.s32.totalorder %s471_s12, 3 }
   0x4   : > { %p161_p2 = pnand %p435_p0, %p160_p1 }
   0x5   : > { %s436_s14 = sshll.u32 (!%p161_p2), %s431_s13, 2 }
   0x6   : > { %164 = sbr.rel (%p161_p2) target bundleno = 337 (0x151), region = 32  ;;  %p195_p3 = scmp.lt.s32.totalorder (!%p161_p2), %s436_s14, 7 }
   0xb   : > { %s564_s14 = smov (!%p195_p3, %s436_s14), 7  ;;  %vm222_vm0 = vcmask 261120   ;;  %v473_v16 = vmov 0  }
   0xc   : > { %s502_s15 = sshll.u32 %s564_s14, 3  ;;  %455 = vset.pattern.permute.xlu0 %v473_v16  ;;  %456 = vset.pattern.permute.xlu1 %v473_v16 }
   0xd   : > { %s198_s18 = scalar_lea.vmem %s559_s0, %s502_s15  ;;  %s204_s21 = scalar_lea.vmem %s560_s1, %s502_s15 }
   0xe   : > { %v508_v0 = vld [vmem:[%s198_s18 + $0x10] sm:$0xff]  ;;  %v510_v1 = vld [vmem:[%s198_s18] sm:$0xff]  ;;  %v512_v2 = vld [vmem:[%s198_s18 + $0x8] sm:$0xff]  ;;  %s210_s24 = scalar_lea.vmem %s561_s2, %s502_s15  ;;  %s216_s27 = scalar_lea.vmem %s562_s3, %s502_s15 }
   0xf   : > { %v229_v3 = vsel %vm222_vm0, %v508_v0, 0.0  ;;  %v223_v4 = vsel %vm222_vm0, %v510_v1, 0.0  ;;  %v235_v5 = vmul.f32 %v510_v1, %v510_v1  ;;  %v226_v7 = vsel %vm222_vm0, %v512_v2, 0.0  ;;  %v525_v9 = vld [vmem:[%s198_s18 + $0x18] sm:$0xff]  ;;  %v279_v49 = vld [vmem:[%s204_s21] sm:$0xff]  ;;  %v280_v52 = vld [vmem:[%s204_s21 + $0x8] sm:$0xff] }
  0x10   : > { %230 = vadd.xlane.f32.xlu1 %v229_v3  ;;  %224 = vadd.xlane.f32.xlu0 %v223_v4  ;;  %v236_v8 = vmul.f32 %v512_v2, %v512_v2  ;;  %v232_v11 = vsel %vm222_vm0, %v525_v9, 0.0  ;;  %v238_v12 = vmul.f32 %v525_v9, %v525_v9  ;;  %v237_v13 = vmul.f32 %v508_v0, %v508_v0  ;;  %v281_v55 = vld [vmem:[%s204_s21 + $0x10] sm:$0xff]  ;;  %v282_v59 = vld [vmem:[%s204_s21 + $0x18] sm:$0xff]  ;;  %v283_v62 = vld [vmem:[%s210_s24] sm:$0xff] }
  0x11   : > { %v239_v6 = vsel %vm222_vm0, %v235_v5, 0.0  ;;  %v284_v4 = vld [vmem:[%s210_s24 + $0x8] sm:$0xff] }
  0x12   : > { %v242_v10 = vsel %vm222_vm0, %v236_v8, 0.0  ;;  %v248_v14 = vsel %vm222_vm0, %v238_v12, 0.0  ;;  %v245_v15 = vsel %vm222_vm0, %v237_v13, 0.0 }
  0x14   : > { %240 = vadd.xlane.f32.xlu1 %v239_v6  ;;  %227 = vadd.xlane.f32.xlu0 %v226_v7  ;;  %v285_v7 = vld [vmem:[%s210_s24 + $0x10] sm:$0xff] }
  0x18   : > { %243 = vadd.xlane.f32.xlu1 %v242_v10  ;;  %233 = vadd.xlane.f32.xlu0 %v232_v11  ;;  %v286_v11 = vld [vmem:[%s210_s24 + $0x18] sm:$0xff] }
  0x1c   : > { %249 = vadd.xlane.f32.xlu1 %v248_v14  ;;  %246 = vadd.xlane.f32.xlu0 %v245_v15 }
  0x99   : > { %v231_v17 = vpop.xlane.xlu1 %230  ;;  %v225_v18 = vpop.xlane.xlu0 %224 }
  0x9a   : > { %v251_v19 = vmul.f32 0.03125, %v225_v18  ;;  %v253_v26 = vmul.f32 0.03125, %v231_v17 }
  0x9c   : > { %v259_v22 = vmul.f32 %v251_v19, %v251_v19  ;;  %v261_v35 = vmul.f32 %v253_v26, %v253_v26 }
  0x9d   : > { %v241_v20 = vpop.xlane.xlu1 %240  ;;  %v228_v21 = vpop.xlane.xlu0 %227 }
  0x9e   : > { %v255_v23 = vmul.f32 0.03125, %v241_v20  ;;  %v252_v24 = vmul.f32 0.03125, %v228_v21 }
  0xa0   : > { %v263_v25 = vsub.f32 %v255_v23, %v259_v22  ;;  %v260_v30 = vmul.f32 %v252_v24, %v252_v24 }
  0xa1   : > { %v244_v27 = vpop.xlane.xlu1 %243  ;;  %v234_v28 = vpop.xlane.xlu0 %233 }
  0xa2   : > { %v267_v29 = vmax.f32 %v263_v25, 0.0  ;;  %v256_v31 = vmul.f32 0.03125, %v244_v27  ;;  %v254_v32 = vmul.f32 0.03125, %v234_v28 }
  0xa4   : > { %v271_v33 = vadd.f32 1e-05, %v267_v29  ;;  %v264_v34 = vsub.f32 %v256_v31, %v260_v30  ;;  %v262_v36 = vmul.f32 %v254_v32, %v254_v32 }
  0xa5   : > { %v250_v37 = vpop.xlane.xlu1 %249  ;;  %v247_v38 = vpop.xlane.xlu0 %246 }
  0xa6   : > { %457 = vrsqrt.f32 %v271_v33  ;;  %v268_v39 = vmax.f32 %v264_v34, 0.0  ;;  %v258_v40 = vmul.f32 0.03125, %v250_v37  ;;  %v257_v41 = vmul.f32 0.03125, %v247_v38 }
  0xa8   : > { %v272_v42 = vadd.f32 1e-05, %v268_v39  ;;  %v266_v43 = vsub.f32 %v258_v40, %v262_v36  ;;  %v265_v44 = vsub.f32 %v257_v41, %v261_v35 }
  0xaa   : > { %459 = vrsqrt.f32 %v272_v42  ;;  %v270_v45 = vmax.f32 %v266_v43, 0.0  ;;  %v269_v46 = vmax.f32 %v265_v44, 0.0 }
  0xac   : > { %v273_v47 = vadd.f32 1e-05, %v269_v46  ;;  %v274_v48 = vadd.f32 1e-05, %v270_v45 }
  0xae   : > { %461 = vrsqrt.f32 %v273_v47 }
  0xaf   : > { %463 = vrsqrt.f32 %v274_v48 }
  0xb3   : > { %v458_v50 = vpop.eup %457 }
  0xb4   : > { %v287_v51 = vmul.f32 %v458_v50, %v279_v49 }
  0xb6   : > { %301 = vperm.xlu0 %455, %v287_v51   ;;  %v291_v61 = vmul.f32 %v287_v51, %v251_v19 }
  0xb7   : > { %v460_v53 = vpop.eup %459 }
  0xb8   : > { %v288_v54 = vmul.f32 %v460_v53, %v280_v52  ;;  %v295_v63 = vsub.f32 %v283_v62, %v291_v61 }
  0xba   : > { %306 = vperm.xlu1 %456, %v288_v54   ;;  %v292_v3 = vmul.f32 %v288_v54, %v252_v24 }
  0xbb   : > { %v462_v56 = vpop.eup %461 }
  0xbc   : > { %v289_v57 = vmul.f32 %v462_v56, %v281_v55  ;;  %v464_v58 = vpop.eup %463  ;;  %v296_v5 = vsub.f32 %v284_v4, %v292_v3 }
  0xbd   : > { %v290_v60 = vmul.f32 %v464_v58, %v282_v59 }
  0xbe   : > { %311 = vperm.xlu1 %456, %v289_v57   ;;  %v293_v6 = vmul.f32 %v289_v57, %v253_v26 }
  0xbf   : > { %v294_v10 = vmul.f32 %v290_v60, %v254_v32 }
  0xc0   : > { %v297_v8 = vsub.f32 %v285_v7, %v293_v6 }
  0xc1   : > { %v298_v12 = vsub.f32 %v286_v11, %v294_v10 }
  0xc2   : > { %316 = vperm.xlu1 %456, %v290_v60  }
  0xc6   : > { %325 = vperm.xlu1 %456, %v295_v63  }
  0xca   : > { %330 = vperm.xlu1 %456, %v296_v5  }
  0xce   : > { %335 = vperm.xlu1 %456, %v297_v8  }
  0xd2   : > { %340 = vperm.xlu1 %456, %v298_v12  }
 0x131   : > { %v302_v15 = vpop.permute.xlu0 %301 }
 0x132   : > { %v319_v17 = vmul.f32 %v302_v15, %v510_v1 }
 0x135   : > { %v307_v13 = vpop.permute.xlu1 %306 }
 0x136   : > { %v320_v20 = vmul.f32 %v307_v13, %v512_v2 }
 0x139   : > { %v312_v14 = vpop.permute.xlu1 %311 }
 0x13a   : > { %v321_v23 = vmul.f32 %v312_v14, %v508_v0 }
 0x13d   : > { %v317_v16 = vpop.permute.xlu1 %316 }
 0x13e   : > { %v322_v1 = vmul.f32 %v317_v16, %v525_v9 }
 0x141   : > { %v326_v18 = vpop.permute.xlu1 %325 }
 0x142   : > { %v343_v19 = vadd.f32 %v326_v18, %v319_v17 }
 0x144   : > { %347 = vst.msk [vmem:[%s216_s27] sm:$0xff] %vm222_vm0, %v343_v19 }
 0x145   : > { %v331_v21 = vpop.permute.xlu1 %330 }
 0x146   : > { %v344_v22 = vadd.f32 %v331_v21, %v320_v20 }
 0x148   : > { %348 = vst.msk [vmem:[%s216_s27 + $0x8] sm:$0xff] %vm222_vm0, %v344_v22 }
 0x149   : > { %v336_v24 = vpop.permute.xlu1 %335 }
 0x14a   : > { %v345_v25 = vadd.f32 %v336_v24, %v321_v23 }
 0x14c   : > { %349 = vst.msk [vmem:[%s216_s27 + $0x10] sm:$0xff] %vm222_vm0, %v345_v25 }
 0x14d   : > { %v341_v26 = vpop.permute.xlu1 %340 }
 0x14e   : > { %v346_v27 = vadd.f32 %v341_v26, %v322_v1 }
 0x150   : > { %350 = vst.msk [vmem:[%s216_s27 + $0x18] sm:$0xff] %vm222_vm0, %v346_v27 }
 0x151 PF: > { %s13_s12 = sadd.s32 1, %s471_s12  }
 0x152   : > { %p10_p4 = scmp.ge.s32.totalorder %s13_s12, 4  }
 0x154   :  { %12 = sbr.rel (!%p10_p4) target bundleno = 1 (0x1), region = 68 }

</bundles_post_ra>
